<compile_context>
chip_gen: v5e
topology: v5e:2x2
jax: 0.10.0
libtpu: 0.0.40
codegen_flags: <defaults>
</compile_context>

<pallas_src>
import functools
import math

import jax
import jax.numpy as jnp
from jax import lax
from jax.experimental import pallas as pl
from jax.experimental.pallas import tpu as pltpu
from jax.scipy.linalg import block_diag

NEG_SLOPE = 0.2                      # LeakyReLU slope in the reference module
BN_EPS = 1e-5                        # discriminator BN eps (torch default)
LAST_BIAS = False                    # matches the reference (no biases anywhere)


def _round_up(v, m):
    return -(-v // m) * m


def _leaky(x):
    return jnp.where(x >= 0, x, NEG_SLOPE * x)


@functools.lru_cache(maxsize=None)
def _vmem_budget_bytes():
    """Generation-aware VMEM budget: ~65% of physical, clamped to [40, 96] MiB.

    v5e/v6e (128 MiB physical) -> ~83 MiB; v7x (64 MiB) -> ~42 MiB; unknown -> ~42 MiB.
    """
    cap = 64 * 1024 * 1024
    try:
        cap = int(pltpu.get_tpu_info().vmem_capacity_bytes)
    except Exception:
        pass
    return max(40 << 20, min(int(cap * 0.65), 96 << 20))


# ==========================================================================
# Pallas kernels
# ==========================================================================
def _conv_taps(x_ref, w_ref):
    """acc[m] = sum_q dot(x, w[q])[m + q]: the horizontal 3x3 tap groups, f32 accum.

    x_ref: (TM, Kp) bf16 patch rows (TM = TR * Wt, Kp = pad128(stride*3*Cin))
    w_ref: (nq, Kp, Cp) bf16 tap-group weights (Cp = pad128(Cout))
    """
    xv = x_ref[...]
    tm = xv.shape[0]
    acc = jnp.dot(xv, w_ref[0], preferred_element_type=jnp.float32)
    for q in range(1, w_ref.shape[0]):
        y = jnp.dot(xv, w_ref[q], preferred_element_type=jnp.float32)
        acc = acc + pltpu.roll(y, shift=tm - q, axis=0)   # out[m] += y[(m+q) % tm]
    return acc


def _conv_kernel(x_ref, w_ref, o_ref, *, fuse_act):
    # No-BN layers: no mask, no reductions, no sums output (gated epilogue).
    acc = _conv_taps(x_ref, w_ref)
    if fuse_act:
        acc = _leaky(acc)
    o_ref[...] = acc.astype(o_ref.dtype)


def _conv_kernel_bn(x_ref, w_ref, o_ref, s_ref, *, wt, wo):
    # BN layers: bf16 output + per-tile [sum, sum-of-squares] over valid columns,
    # taken from the f32 accumulator.  Column validity (row % Wt < Wo) is rebuilt
    # in-kernel with an f32 iota (exact for these row counts), no mask input needed.
    acc = _conv_taps(x_ref, w_ref)
    o_ref[...] = acc.astype(o_ref.dtype)
    tm, cp = acc.shape
    row = lax.broadcasted_iota(jnp.float32, (tm, cp), 0)
    col = row - jnp.floor(row / wt) * wt
    am = jnp.where(col < wo, acc, 0.0)
    s_ref[0, 0:1, :] = jnp.sum(am, axis=0, keepdims=True)
    s_ref[0, 1:2, :] = jnp.sum(am * am, axis=0, keepdims=True)


def _pool_kernel(x_ref, o_ref, acc_ref, *, wo, hw):
    # AdaptiveAvgPool2d(1) / AdaptiveMaxPool2d(1) / StdPool (unbiased std over H,W),
    # tiled over HW with a VMEM accumulator; iota mask instead of width slicing.
    t = pl.program_id(1)

    @pl.when(t == 0)
    def _():
        acc_ref[...] = jnp.zeros_like(acc_ref)
        acc_ref[2:3, :] = jnp.full((1, acc_ref.shape[1]), -jnp.inf, jnp.float32)

    xv = x_ref[...].astype(jnp.float32)                   # (thr, Wt, Cp)
    col = lax.broadcasted_iota(jnp.int32, xv.shape, 1)
    valid = col < wo
    xs = jnp.where(valid, xv, 0.0)
    xm = jnp.where(valid, xv, -jnp.inf)
    s2d = jnp.sum(xs, axis=0)                             # (Wt, Cp)
    q2d = jnp.sum(xs * xs, axis=0)
    m2d = jnp.max(xm, axis=0)
    acc_ref[0:1, :] += jnp.sum(s2d, axis=0, keepdims=True)
    acc_ref[1:2, :] += jnp.sum(q2d, axis=0, keepdims=True)
    acc_ref[2:3, :] = jnp.maximum(acc_ref[2:3, :],
                                  jnp.max(m2d, axis=0, keepdims=True))

    @pl.when(t == pl.num_programs(1) - 1)
    def _():
        s1 = acc_ref[0:1, :]
        mean = s1 / hw
        var = jnp.maximum((acc_ref[1:2, :] - s1 * mean) / max(hw - 1, 1), 0.0)
        o_ref[0, 0:1, :] = mean
        o_ref[0, 1:2, :] = acc_ref[2:3, :]
        o_ref[0, 2:3, :] = jnp.sqrt(var)


def _cp_mlp_kernel(s_ref, w1_ref, g1_ref, b1_ref, w2_ref, g2_ref, b2_ref,
                   w3_ref, o_ref, *, eps):
    # ChannelsPool MLP: conv1x1 -> BN(affine) -> LReLU -> conv1x1 -> BN -> LReLU -> conv1x1
    def bn(h, g, b):
        n = h.shape[0]
        mean = jnp.sum(h, axis=0, keepdims=True) / n
        var = jnp.sum((h - mean) ** 2, axis=0, keepdims=True) / n
        return (h - mean) * lax.rsqrt(var + eps) * g + b

    h = jnp.dot(s_ref[...], w1_ref[...], preferred_element_type=jnp.float32)
    h = _leaky(bn(h, g1_ref[...], b1_ref[...]))
    h = jnp.dot(h, w2_ref[...], preferred_element_type=jnp.float32)
    h = _leaky(bn(h, g2_ref[...], b2_ref[...]))
    o_ref[...] = jnp.dot(h, w3_ref[...], preferred_element_type=jnp.float32)


# ==========================================================================
# Pallas-call wrappers
# ==========================================================================
def _build_patches(x, stride):
    """(N,H,W,C) -> bf16 (N*Ho, Wt, Kp) patches.

    The 3 vertical (kh) taps are stacked along channels, the width is phase-
    decomposed for the stride, and Kin is zero-padded to a lane-dense 128-multiple.
    """
    N, H, W, C = x.shape
    s = stride
    Ho = (H - 1) // s + 1
    Wo = (W - 1) // s + 1
    kc = 3 * C
    Wt = Wo + 2 // s
    xp = jnp.pad(x, ((0, 0), (1, 1), (1, 1), (0, 0)))
    xk = jnp.concatenate(
        [xp[:, kh:kh + s * (Ho - 1) + 1:s, :, :] for kh in range(3)], axis=-1)
    need_w = s * Wt
    if need_w > W + 2:
        xk = jnp.pad(xk, ((0, 0), (0, 0), (0, need_w - (W + 2)), (0, 0)))
    kin = s * kc
    kp = _round_up(kin, 128)
    patches = xk.reshape(N * Ho, Wt, kin).astype(jnp.bfloat16)
    if kp > kin:
        patches = jnp.pad(patches, ((0, 0), (0, 0), (0, kp - kin)))
    return patches, Ho, Wo, Wt


def _choose_tr(r, wt, kp, cp, nq, budget):
    """Row-tile size: TM = TR*Wt a multiple of 8, ~2k rows, realistic VMEM cost."""
    f = 8 // math.gcd(wt, 8)
    r_up = _round_up(r, f)
    w_bytes = 2 * nq * kp * cp * 2                  # double-buffered bf16 weights

    def tile_bytes(t):
        tm = t * wt
        return (2 * tm * kp * 2                     # bf16 input, double buffered
                + 2 * tm * cp * 2                   # bf16 output, double buffered
                + 2 * tm * cp * 4                   # f32 accumulator + rolled tap
                + tm * kp * 2)                      # loaded patch value

    tr = min(max(f, _round_up(max(1, 2048 // wt), f)), r_up)
    limit = int(budget * 0.85)
    while tr > f and w_bytes + tile_bytes(tr) > limit:
        tr = max(f, ((tr // 2) // f) * f)
    return tr


def conv3x3_pallas(x, w_q, stride, fuse_act=False, emit_sums=False):
    """Grouped 3x3 conv (pad=1) as one tiled Pallas MXU kernel.

    Returns (out2, sums, dims): out2 is (R_pad*Wt, Cp) bf16 in padded row layout,
    sums are (ntiles, 2, Cp) f32 BatchNorm partials (None unless emit_sums).
    """
    N, H, W, C = x.shape
    patches, Ho, Wo, Wt = _build_patches(x, stride)
    R = N * Ho
    Kp = patches.shape[-1]
    nq, kin_w, Cp = w_q.shape
    assert kin_w == Kp, (kin_w, Kp)
    budget = _vmem_budget_bytes()
    TR = _choose_tr(R, Wt, Kp, Cp, nq, budget)
    R_pad = _round_up(R, TR)
    if R_pad > R:
        patches = jnp.pad(patches, ((0, R_pad - R), (0, 0), (0, 0)))
    x2 = patches.reshape(R_pad * Wt, Kp)
    TM = TR * Wt
    ntiles = R_pad // TR
    cparams = pltpu.CompilerParams(dimension_semantics=("parallel",),
                                   vmem_limit_bytes=budget)
    in_specs = [pl.BlockSpec((TM, Kp), lambda i: (i, 0)),
                pl.BlockSpec((nq, Kp, Cp), lambda i: (0, 0, 0))]   # weights resident

    if emit_sums:
        out2, sums = pl.pallas_call(
            functools.partial(_conv_kernel_bn, wt=Wt, wo=Wo),
            out_shape=(jax.ShapeDtypeStruct((R_pad * Wt, Cp), jnp.bfloat16),
                       jax.ShapeDtypeStruct((ntiles, 2, Cp), jnp.float32)),
            grid=(ntiles,),
            in_specs=in_specs,
            out_specs=(pl.BlockSpec((TM, Cp), lambda i: (i, 0)),
                       pl.BlockSpec((1, 2, Cp), lambda i: (i, 0, 0))),
            compiler_params=cparams,
        )(x2, w_q)
    else:
        out2 = pl.pallas_call(
            functools.partial(_conv_kernel, fuse_act=fuse_act),
            out_shape=jax.ShapeDtypeStruct((R_pad * Wt, Cp), jnp.bfloat16),
            grid=(ntiles,),
            in_specs=in_specs,
            out_specs=pl.BlockSpec((TM, Cp), lambda i: (i, 0)),
            compiler_params=cparams,
        )(x2, w_q)
        sums = None

    dims = dict(N=N, Ho=Ho, Wo=Wo, Wt=Wt, R=R, R_pad=R_pad, TM=TM, Cp=Cp)
    return out2, sums, dims


def pool_stats_pallas(out2, dims):
    """(N, 3, Cp): per-channel [avg, max, std] of the raw conv output (torch order)."""
    N, Ho, Wo, Wt, Cp, R_pad = (dims["N"], dims["Ho"], dims["Wo"], dims["Wt"],
                                dims["Cp"], dims["R_pad"])
    x3 = out2.reshape(R_pad, Wt, Cp)
    budget = min(_vmem_budget_bytes() // 4, 16 << 20)
    thr = 1
    for d in range(Ho, 0, -1):            # largest divisor of Ho whose tile fits
        if Ho % d == 0 and (2 * d * Wt * Cp * 2 + d * Wt * Cp * 4) <= budget:
            thr = d
            break
    nt = Ho // thr
    return pl.pallas_call(
        functools.partial(_pool_kernel, wo=Wo, hw=Ho * Wo),
        out_shape=jax.ShapeDtypeStruct((N, 3, Cp), jnp.float32),
        grid=(N, nt),
        in_specs=[pl.BlockSpec((thr, Wt, Cp), lambda n, t: (n * nt + t, 0, 0))],
        out_specs=pl.BlockSpec((1, 3, Cp), lambda n, t: (n, 0, 0)),
        scratch_shapes=[pltpu.VMEM((8, Cp), jnp.float32)],
        compiler_params=pltpu.CompilerParams(
            dimension_semantics=("parallel", "arbitrary"),
            vmem_limit_bytes=_vmem_budget_bytes()),
    )(x3)


def channels_pool_mlp(stats, p):
    n = stats.shape[0]
    out_ch = p["w3"].shape[-1]
    return pl.pallas_call(
        functools.partial(_cp_mlp_kernel, eps=1e-5),
        out_shape=jax.ShapeDtypeStruct((n, out_ch), jnp.float32),
        compiler_params=pltpu.CompilerParams(vmem_limit_bytes=_vmem_budget_bytes()),
    )(stats, p["w1"], p["g1"], p["b1"], p["w2"], p["g2"], p["b2"], p["w3"])


# ==========================================================================
# deterministic parameter init (block-diagonal dense weights for grouped convs)
# ==========================================================================
def _block_diag_from_groups(wg):
    return block_diag(*[wg[g] for g in range(wg.shape[0])])


def _pack_conv3x3_weight(w, stride):
    """(3,3,groups,cin_g,cout_g) -> (nq, Kp, Cp) bf16 tap-group block-diag weights."""
    _, _, groups, cin_g, cout_g = w.shape
    cin = groups * cin_g
    cout = groups * cout_g
    s = stride
    cp = _round_up(cout, 128)
    kc = 3 * cin
    kp = _round_up(s * kc, 128)
    nq = -(-3 // s)
    wq = jnp.zeros((nq, kp, cp), jnp.float32)
    for q in range(nq):
        for r in range(s):
            kw = s * q + r
            if kw >= 3:
                continue
            for kh in range(3):
                dense = _block_diag_from_groups(w[kh, kw])      # (cin, cout)
                row0 = r * kc + kh * cin
                wq = wq.at[q, row0:row0 + cin, :cout].set(dense)
    return wq.astype(jnp.bfloat16)


def init_conv3x3(key, cin, cout, groups, stride):
    cin_g, cout_g = cin // groups, cout // groups
    fan_in = cin_g * 9
    w = jax.random.normal(key, (3, 3, groups, cin_g, cout_g),
                          jnp.float32) / jnp.sqrt(float(fan_in))
    return {"w": _pack_conv3x3_weight(w, stride), "cout": cout}


def init_conv1x1(key, cin, cout, groups):
    cin_g, cout_g = cin // groups, cout // groups
    w = jax.random.normal(key, (groups, cin_g, cout_g),
                          jnp.float32) / jnp.sqrt(float(cin_g))
    return _block_diag_from_groups(w)


def init_channels_pool(key, c, groups_outer, channels_as_groups=True):
    pools = 3                                     # ('avg', 'max', 'std')
    groups = (pools if channels_as_groups else 1) * groups_outer
    cin = c * pools
    chid = c * groups
    cout = 1 * groups
    k1, k2, k3 = jax.random.split(key, 3)
    return dict(
        w1=init_conv1x1(k1, cin, chid, groups),
        g1=jnp.ones((1, chid), jnp.float32), b1=jnp.zeros((1, chid), jnp.float32),
        w2=init_conv1x1(k2, chid, chid, groups),
        g2=jnp.ones((1, chid), jnp.float32), b2=jnp.zeros((1, chid), jnp.float32),
        w3=init_conv1x1(k3, chid, cout, groups),
    )


def cartoongan_discriminator_init(key, input_channels, layers, strides, mlp_idx,
                                  groups, multiplier):
    def r(v):
        return round(v * multiplier) * groups

    layers = [r(l) for l in layers]
    in_ch = [input_channels] + layers[:-1]
    out_ch = layers
    params = {"convs": [], "cp": {}, "use_norm": [], "strides": list(strides),
              "groups": groups, "eps": BN_EPS}
    keys = jax.random.split(key, len(strides) + 1 + len(mlp_idx))
    ki = 0
    for i in range(len(strides)):
        params["convs"].append(
            init_conv3x3(keys[ki], in_ch[i], out_ch[i], groups, strides[i]))
        ki += 1
        params["use_norm"].append(i > 0 and strides[i] == 1)
        if i in mlp_idx:
            params["cp"][i] = init_channels_pool(keys[ki], out_ch[i], groups)
            ki += 1
    added = 1 if groups == 1 else 0          # MinibatchSTD only when groups == 1
    params["final_conv"] = init_conv3x3(keys[ki], out_ch[-1] + added, groups,
                                        groups, 1)
    return params


# ==========================================================================
# forward passes
# ==========================================================================
def cartoongan_discriminator_forward(params, x_nhwc, use_sigmoid=False,
                                     apply_sigmoid=True):
    x = x_nhwc                                   # (x - mean)/std is identity (0, 1)
    strides = params["strides"]
    eps = params["eps"]
    stats_list = []
    for i, stride in enumerate(strides):
        conv_p = params["convs"][i]
        cout = conv_p["cout"]
        use_norm = params["use_norm"][i]
        tapped = i in params["cp"]
        fuse_act = (not use_norm) and (not tapped)   # LReLU fused into conv epilogue
        out2, sums, d = conv3x3_pallas(x, conv_p["w"], stride,
                                       fuse_act=fuse_act, emit_sums=use_norm)

        if tapped:
            # ChannelsPool taps the RAW conv output (same as the reference module)
            pooled = pool_stats_pallas(out2, d)                   # (N, 3, Cp)
            pooled = pooled[:, :, :cout].reshape(d["N"], 3 * cout)
            stats_list.append(channels_pool_mlp(pooled, params["cp"][i]))

        # back to NHWC with padding stripped; the BN scale/bias + LeakyReLU below are
        # plain jnp ops that XLA fuses into the next layer's patch build (no extra
        # Pallas pass / HBM round trip).
        x = out2.reshape(d["R_pad"], d["Wt"], -1)[:d["R"], :d["Wo"], :cout]
        x = x.reshape(d["N"], d["Ho"], d["Wo"], cout)

        if use_norm:
            # BatchNorm2d(affine=False, track_running_stats=False) from conv side-sums
            cnt = float(d["R"] * d["Wo"])
            s1 = jnp.sum(sums[:, 0, :cout], axis=0)
            s2 = jnp.sum(sums[:, 1, :cout], axis=0)
            mean = s1 / cnt
            var = jnp.maximum(s2 / cnt - mean * mean, 0.0)
            scale = lax.rsqrt(var + eps)
            bias = -mean * scale
            x = _leaky(x.astype(jnp.float32) * scale + bias).astype(jnp.bfloat16)
        elif tapped:
            x = _leaky(x.astype(jnp.float32)).astype(jnp.bfloat16)
        # (fuse_act layers already had LeakyReLU applied inside the conv kernel)

    if params["groups"] == 1:
        # MinibatchSTD: torch.std over the channel dim, unbiased.
        xf = x.astype(jnp.float32)
        mbstd = jnp.std(xf, axis=-1, ddof=1, keepdims=True)
        x = jnp.concatenate([xf, mbstd], axis=-1)

    out2, _, d = conv3x3_pallas(x, params["final_conv"]["w"], 1)
    cf = params["final_conv"]["cout"]
    score = out2.reshape(d["R_pad"], d["Wt"], -1)[:d["R"], :d["Wo"], :cf]
    score = score.reshape(d["N"], d["Ho"], d["Wo"], cf).astype(jnp.float32)

    stats = jnp.concatenate(stats_list, axis=1) if stats_list else None
    if use_sigmoid and apply_sigmoid:
        score = jax.nn.sigmoid(score)
        if stats is not None:
            stats = jax.nn.sigmoid(stats)
    return score, stats


def style_representation(x_nhwc, r=5):
    # TODO(synk): StyleRepresentation source not provided; deterministic stand-in
    #             (color_shift_with_sobel -> [gray, sobel_x, sobel_y],
    #              surface -> (2r+1)x(2r+1) box filter, identity -> x), 9 channels.
    N, H, W, C = x_nhwc.shape
    k = 2 * r + 1
    box = jnp.ones((k, k, 1, C), jnp.float32) / float(k * k)
    surface = lax.conv_general_dilated(
        x_nhwc, box, (1, 1), "SAME",
        dimension_numbers=("NHWC", "HWIO", "NHWC"), feature_group_count=C)
    gray = jnp.mean(x_nhwc, axis=-1, keepdims=True)
    sob_x = jnp.array([[-1., 0., 1.], [-2., 0., 2.], [-1., 0., 1.]], jnp.float32)
    sob = jnp.stack([sob_x, sob_x.T], axis=-1)[:, :, None, :]   # (3,3,1,2)
    edges = lax.conv_general_dilated(
        gray, sob, (1, 1), "SAME", dimension_numbers=("NHWC", "HWIO", "NHWC"))
    color_shift_sobel = jnp.concatenate([gray, edges], axis=-1)
    return jnp.concatenate([color_shift_sobel, surface, x_nhwc], axis=-1)


def style_cartoongan_discriminator(params, x_nchw, mean=0.0, std=1.0,
                                   apply_sigmoid=True):
    x = x_nchw * std + mean                                  # outer (un)normalization
    x = jnp.transpose(x, (0, 2, 3, 1)).astype(jnp.float32)   # NCHW -> NHWC
    feats = style_representation(x)
    score, stats = cartoongan_discriminator_forward(
        params["disc"], feats, use_sigmoid=False, apply_sigmoid=apply_sigmoid)
    score = jnp.transpose(score, (0, 3, 1, 2))               # NHWC -> NCHW
    if stats is not None:
        stats = stats[:, :, None, None]                      # (N, C, 1, 1) like torch
    return score, stats


# ==========================================================================
if __name__ == "__main__":
    key = jax.random.PRNGKey(0)
    kx, kp, kc = jax.random.split(key, 3)

    # light-weight numerical check of the fused conv kernel vs lax.conv (stride 1 & 2)
    def _check_conv(kk, stride):
        kkx, kkw = jax.random.split(kk)
        n, h, w_, cin, groups, cout = 1, 8, 8, 6, 3, 6
        xin = jax.random.normal(kkx, (n, h, w_, cin), jnp.float32)
        wraw = jax.random.normal(
            kkw, (3, 3, groups, cin // groups, cout // groups), jnp.float32) * 0.2
        out2, _, d = conv3x3_pallas(xin, _pack_conv3x3_weight(wraw, stride), stride)
        got = out2.reshape(d["R_pad"], d["Wt"], -1)[:d["R"], :d["Wo"], :cout]
        got = got.reshape(n, d["Ho"], d["Wo"], cout).astype(jnp.float32)
        hwio = jnp.transpose(wraw, (0, 1, 3, 2, 4)).reshape(
            3, 3, cin // groups, cout)
        want = lax.conv_general_dilated(
            xin, hwio, (stride, stride), ((1, 1), (1, 1)),
            dimension_numbers=("NHWC", "HWIO", "NHWC"), feature_group_count=groups)
        err = float(jnp.max(jnp.abs(got - want)))
        assert err < 0.1, err

    _check_conv(jax.random.fold_in(kc, 1), 1)
    _check_conv(jax.random.fold_in(kc, 2), 2)

    # small example: batch=2, RGB, 16x16 input
    x = jax.random.normal(kx, (2, 3, 16, 16), jnp.float32)

    style_layers = 3        # ('color_shift_with_sobel', 'surface', 'identity')
    disc_params = cartoongan_discriminator_init(
        kp,
        input_channels=3 * style_layers,  # stand-in StyleRepresentation: 9 channels
        layers=(32, 64, 128, 128, 256, 256),
        strides=(1, 2, 1, 2, 1, 1),
        mlp_idx=(1, 3, 5),
        groups=style_layers,
        multiplier=0.125,                 # keep channel counts small for the demo
    )
    params = {"disc": disc_params}

    fwd = jax.jit(lambda inp: style_cartoongan_discriminator(params, inp))
    score, stats = fwd(x)
    jax.block_until_ready((score, stats))

    assert score.shape == (2, 3, 4, 4), score.shape
    assert stats.shape == (2, 27, 1, 1), stats.shape
    assert bool(jnp.all(jnp.isfinite(score))) and bool(jnp.all(jnp.isfinite(stats)))
    print("KERNEL_OK")
</pallas_src>

<mosaic_0001>
module attributes {stable_mosaic.version = 11 : i64} {
  func.func @_conv_kernel(%arg0: i32, %arg1: memref<80x128xbf16, #tpu.memory_space<vmem>>, %arg2: memref<3x128x128xbf16, #tpu.memory_space<vmem>>, %arg3: memref<80x128xbf16, #tpu.memory_space<vmem>>) attributes {dimension_semantics = [#tpu.dimension_semantics<parallel>], iteration_bounds = array<i64: 1>, scalar_prefetch = 0 : i64, scratch_operands = 0 : i64, tpu.core_type = #tpu.core_type<tc>, window_params = [{transform_indices = @transform_0, window_bounds = array<i64: 80, 128>}, {pipeline_mode = #tpu.pipeline_mode<synchronous>, transform_indices = @transform_1, window_bounds = array<i64: 3, 128, 128>}, {transform_indices = @transform_2, window_bounds = array<i64: 80, 128>}]} {
    %c0 = arith.constant 0 : index
    %c0_0 = arith.constant 0 : index
    %0 = vector.load %arg1[%c0, %c0_0] : memref<80x128xbf16, #tpu.memory_space<vmem>>, vector<80x128xbf16>
    %c0_1 = arith.constant 0 : index
    %c0_2 = arith.constant 0 : index
    %c0_3 = arith.constant 0 : index
    %1 = vector.load %arg2[%c0_1, %c0_2, %c0_3] : memref<3x128x128xbf16, #tpu.memory_space<vmem>>, vector<1x128x128xbf16>
    %2 = vector.shape_cast %1 : vector<1x128x128xbf16> to vector<128x128xbf16>
    %cst = arith.constant dense<0.000000e+00> : vector<80x128xf32>
    %3 = tpu.matmul %0, %2, %cst {dimension_numbers = #tpu.dot_dimension_numbers<[1], [0], [0], [1], [0, 0, 1, 1], [], []>} : vector<80x128xbf16>, vector<128x128xbf16>, vector<80x128xf32> -> vector<80x128xf32>
    %c1 = arith.constant 1 : index
    %c0_4 = arith.constant 0 : index
    %c0_5 = arith.constant 0 : index
    %4 = vector.load %arg2[%c1, %c0_4, %c0_5] : memref<3x128x128xbf16, #tpu.memory_space<vmem>>, vector<1x128x128xbf16>
    %5 = vector.shape_cast %4 : vector<1x128x128xbf16> to vector<128x128xbf16>
    %cst_6 = arith.constant dense<0.000000e+00> : vector<80x128xf32>
    %6 = tpu.matmul %0, %5, %cst_6 {dimension_numbers = #tpu.dot_dimension_numbers<[1], [0], [0], [1], [0, 0, 1, 1], [], []>} : vector<80x128xbf16>, vector<128x128xbf16>, vector<80x128xf32> -> vector<80x128xf32>
    %c79_i32 = arith.constant 79 : i32
    %7 = tpu.dynamic_rotate %6 by %c79_i32 dim 0 : vector<80x128xf32>, i32 -> vector<80x128xf32>
    %8 = arith.addf %3, %7 : vector<80x128xf32>
    %c2 = arith.constant 2 : index
    %c0_7 = arith.constant 0 : index
    %c0_8 = arith.constant 0 : index
    %9 = vector.load %arg2[%c2, %c0_7, %c0_8] : memref<3x128x128xbf16, #tpu.memory_space<vmem>>, vector<1x128x128xbf16>
    %10 = vector.shape_cast %9 : vector<1x128x128xbf16> to vector<128x128xbf16>
    %cst_9 = arith.constant dense<0.000000e+00> : vector<80x128xf32>
    %11 = tpu.matmul %0, %10, %cst_9 {dimension_numbers = #tpu.dot_dimension_numbers<[1], [0], [0], [1], [0, 0, 1, 1], [], []>} : vector<80x128xbf16>, vector<128x128xbf16>, vector<80x128xf32> -> vector<80x128xf32>
    %c78_i32 = arith.constant 78 : i32
    %12 = tpu.dynamic_rotate %11 by %c78_i32 dim 0 : vector<80x128xf32>, i32 -> vector<80x128xf32>
    %13 = arith.addf %8, %12 : vector<80x128xf32>
    %14 = arith.truncf %13 : vector<80x128xf32> to vector<80x128xbf16>
    %c0_10 = arith.constant 0 : index
    %c0_11 = arith.constant 0 : index
    %15 = vector.load %arg3[%c0_10, %c0_11] : memref<80x128xbf16, #tpu.memory_space<vmem>>, vector<80x128xbf16>
    tpu.vector_store %arg3[%c0_10, %c0_11], %14 {strides = array<i32>} : memref<80x128xbf16, #tpu.memory_space<vmem>>, vector<80x128xbf16>,
    return
  }
  func.func @transform_0(%arg0: i32) -> (i32, i32) {
    %c0_i32 = arith.constant 0 : i32
    %c0_i32_0 = arith.constant 0 : i32
    return %arg0, %c0_i32 : i32, i32
  }
  func.func @transform_1(%arg0: i32) -> (i32, i32, i32) {
    %c0_i32 = arith.constant 0 : i32
    %c0_i32_0 = arith.constant 0 : i32
    %c0_i32_1 = arith.constant 0 : i32
    %c0_i32_2 = arith.constant 0 : i32
    return %c0_i32, %c0_i32_0, %c0_i32_1 : i32, i32, i32
  }
  func.func @transform_2(%arg0: i32) -> (i32, i32) {
    %c0_i32 = arith.constant 0 : i32
    %c0_i32_0 = arith.constant 0 : i32
    return %arg0, %c0_i32 : i32, i32
  }
}

</mosaic_0001>

<bundles_post_ra>
// kernel: tpu_custom_call.1
= control target key start
LH: loop header
LB: loop body
LE: loop exit
PB: predicated region body
PF: predicated region fallthrough
CT: control target
= control target key end

     0   :  { %7 = vsyncpa [#allocation3], 0  ;;  %s843_s0 = inlined_call_operand.hbm [shape: bf16[80,128], index: 0, kind: input, shape index: {}]   ;;  %s844_s1 = inlined_call_operand.hbm [shape: bf16[3,128,128], index: 1, kind: input, shape index: {}]   ;;  %s845_s2 = inlined_call_operand.hbm [shape: bf16[80,128], index: 2, kind: output, shape index: {}]  }
   0x1   :  { %8 = vsyncpa [#allocation6], 0 }
   0x2   :  { %9 = vsyncpa [#allocation4], 0  ;;  %s14_s11 = sshll.u32 %s843_s0, 4  ;;  %s747_s12 = smov [#allocation2]   ;;  %s15_s11 = int_to_ptr.hbm [resolvable:$true] %s14_s11 }
   0x3   :  { %s16_s13 = sshll.u32 %s747_s12, 4  ;;  %s27_s16 = sshll.u32 %s844_s1, 4  ;;  %s17_s13 = int_to_ptr.vmem [resolvable:$true] %s16_s13  ;;  %s28_s16 = int_to_ptr.hbm [resolvable:$true] %s27_s16 }
   0x4   :  { %s748_s17 = smov 64   ;;  %s749_s18 = smov 4  }
   0x5   :  { %22 = dma.hbm_to_vmem [thread:$0]  %s15_s11, 640, %s17_s13, [#allocation3], %s748_s17, %s748_s17, %s749_s18  }
   0x6   :  { %s750_s19 = smov [#allocation5]  }
   0x7   :  { %s29_s20 = sshll.u32 %s750_s19, 4  ;;  %s30_s20 = int_to_ptr.vmem [resolvable:$true] %s29_s20 }
   0x8   :  { %35 = dma.hbm_to_vmem [thread:$0]  %s28_s16, 3072, %s30_s20, [#allocation6], %s748_s17, %s748_s17, %s749_s18  }
   0x9   :  { %741 = dma.done.wait [#allocation3], 640  }
   0xa   :  { %742 = vsyncadd [#allocation3], 4294966656 }
   0xb   :  { %743 = dma.done.wait [#allocation6], 3072  }
   0xc   :  { %744 = vsyncadd [#allocation6], 4294964224  ;;  %v610_v0 = vld [vmem:[#allocation5 + $0x78] sm:$0xff]  ;;  %v609_v2 = vld [vmem:[#allocation5 + $0x70] sm:$0xff]  ;;  %v209_v39 = vlaneseq  ;;  %s751_s0 = smov [#allocation7]   ;;  %s460_s23 = sshll.u32 %s845_s2, 4  ;;  %s461_s23 = int_to_ptr.hbm [resolvable:$true] %s460_s23 }
   0xd   :  { %v618_v1 = vld [vmem:[#allocation5 + $0xb8] sm:$0xff]  ;;  %165 = vmatpush.bf16.msra.mxu0 %v610_v0  ;;  %648 = vmatpush.bf16.msra.mxu3 %v610_v0  ;;  %v617_v4 = vld [vmem:[#allocation5 + $0xb0] sm:$0xff]  ;;  %v608_v6 = vld [vmem:[#allocation5 + $0x68] sm:$0xff]  ;;  %s458_s1 = sshll.u32 %s751_s0, 4  ;;  %s459_s1 = int_to_ptr.vmem [resolvable:$true] %s458_s1 }
   0xe   :  { %v602_v3 = vld [vmem:[#allocation5 + $0x38] sm:$0xff]  ;;  %369 = vmatpush.bf16.msra.mxu2 %v618_v1  ;;  %v601_v5 = vld [vmem:[#allocation5 + $0x30] sm:$0xff]  ;;  %v616_v7 = vld [vmem:[#allocation5 + $0xa8] sm:$0xff]  ;;  %v784_v43 = vshrl.u32 %v209_v39, 7 }
   0xf   :  { %656 = vmatpush.bf16.msra.mxu1 %v602_v3  ;;  %v600_v8 = vld [vmem:[#allocation5 + $0x28] sm:$0xff]  ;;  %v607_v9 = vld [vmem:[#allocation5 + $0x60] sm:$0xff]  ;;  %v606_v12 = vld [vmem:[#allocation5 + $0x58] sm:$0xff] }
  0x10   :  { %v615_v10 = vld [vmem:[#allocation5 + $0xa0] sm:$0xff]  ;;  %v614_v13 = vld [vmem:[#allocation5 + $0x98] sm:$0xff]  ;;  %v605_v15 = vld [vmem:[#allocation5 + $0x50] sm:$0xff]  ;;  %vm211_vm0 = vcmp.lt.s32.totalorder %v784_v43, 7  ;;  %vm413_vm1 = vcmp.lt.s32.totalorder %v784_v43, 6 }
  0x11   :  { %166 = vmatpush.bf16.msra.mxu0 %v609_v2  ;;  %649 = vmatpush.bf16.msra.mxu3 %v609_v2  ;;  %v599_v11 = vld [vmem:[#allocation5 + $0x20] sm:$0xff]  ;;  %v598_v14 = vld [vmem:[#allocation5 + $0x18] sm:$0xff]  ;;  %v613_v16 = vld [vmem:[#allocation5 + $0x90] sm:$0xff] }
  0x12   :  { %370 = vmatpush.bf16.msra.mxu2 %v617_v4  ;;  %v597_v17 = vld [vmem:[#allocation5 + $0x10] sm:$0xff]  ;;  %v604_v18 = vld [vmem:[#allocation5 + $0x48] sm:$0xff]  ;;  %v603_v21 = vld [vmem:[#allocation5 + $0x40] sm:$0xff] }
  0x13   :  { %657 = vmatpush.bf16.msra.mxu1 %v601_v5  ;;  %v612_v19 = vld [vmem:[#allocation5 + $0x88] sm:$0xff]  ;;  %v611_v22 = vld [vmem:[#allocation5 + $0x80] sm:$0xff]  ;;  %v590_v25 = vld [vmem:[#allocation2] sm:$0xff] }
  0x14   :  { %v596_v20 = vld [vmem:[#allocation5 + $0x8] sm:$0xff]  ;;  %v595_v23 = vld [vmem:[#allocation5] sm:$0xff]  ;;  %v593_v27 = vld [vmem:[#allocation2 + $0x18] sm:$0xff] }
  0x15   :  { %167 = vmatpush.bf16.msra.mxu0 %v608_v6  ;;  %650 = vmatpush.bf16.msra.mxu3 %v608_v6  ;;  %v591_v24 = vld [vmem:[#allocation2 + $0x8] sm:$0xff]  ;;  %v592_v26 = vld [vmem:[#allocation2 + $0x10] sm:$0xff]  ;;  %v594_v28 = vld [vmem:[#allocation2 + $0x20] sm:$0xff] }
  0x16   :  { %371 = vmatpush.bf16.msra.mxu2 %v616_v7 }
  0x17   :  { %658 = vmatpush.bf16.msra.mxu1 %v600_v8 }
  0x19   :  { %168 = vmatpush.bf16.msra.mxu0 %v607_v9  ;;  %651 = vmatpush.bf16.msra.mxu3 %v607_v9 }
  0x1a   :  { %372 = vmatpush.bf16.msra.mxu2 %v615_v10 }
  0x1b   :  { %659 = vmatpush.bf16.msra.mxu1 %v599_v11 }
  0x1d   :  { %169 = vmatpush.bf16.msra.mxu0 %v606_v12  ;;  %652 = vmatpush.bf16.msra.mxu3 %v606_v12 }
  0x1e   :  { %373 = vmatpush.bf16.msra.mxu2 %v614_v13 }
  0x1f   :  { %660 = vmatpush.bf16.msra.mxu1 %v598_v14 }
  0x21   :  { %170 = vmatpush.bf16.msra.mxu0 %v605_v15  ;;  %653 = vmatpush.bf16.msra.mxu3 %v605_v15 }
  0x22   :  { %374 = vmatpush.bf16.msra.mxu2 %v613_v16 }
  0x23   :  { %661 = vmatpush.bf16.msra.mxu1 %v597_v17 }
  0x25   :  { %171 = vmatpush.bf16.msra.mxu0 %v604_v18  ;;  %654 = vmatpush.bf16.msra.mxu3 %v604_v18 }
  0x26   :  { %375 = vmatpush.bf16.msra.mxu2 %v612_v19 }
  0x27   :  { %662 = vmatpush.bf16.msra.mxu1 %v596_v20 }
  0x29   :  { %172 = vmatpush.bf16.msra.mxu0 %v603_v21  ;;  %655 = vmatpush.bf16.msra.mxu3 %v603_v21 }
  0x2a   :  { %376 = vmatpush.bf16.msra.mxu2 %v611_v22 }
  0x2b   :  { %663 = vmatpush.bf16.msra.mxu1 %v595_v23 }
  0x2c   :  { %178 = vmatmul.bf16.vlgmr.msra.gmra.mxu3 %v591_v24  ;;  %173 = vmatmul.bf16.vlgmr.msra.gmra.mxu0 %v590_v25 }
  0x2d   :  { %270 = vmatpush.bf16.msrb.mxu0 %v602_v3  ;;  %377 = vmatmul.bf16.vlgmr.msra.gmra.mxu2 %v590_v25 }
  0x2e   :  { %283 = vmatmul.bf16.vlgmr.msra.gmra.mxu1 %v591_v24 }
  0x31   :  { %271 = vmatpush.bf16.msrb.mxu0 %v601_v5 }
  0x35   :  { %272 = vmatpush.bf16.msrb.mxu0 %v600_v8 }
  0x39   :  { %273 = vmatpush.bf16.msrb.mxu0 %v599_v11 }
  0x3c   :  { %183 = vmatmul.bf16.gmra.mxu3 %v592_v26 }
  0x3d   :  { %274 = vmatpush.bf16.msrb.mxu0 %v598_v14  ;;  %382 = vmatmul.bf16.gmra.mxu2 %v591_v24 }
  0x3e   :  { %288 = vmatmul.bf16.gmra.mxu1 %v592_v26 }
  0x41   :  { %275 = vmatpush.bf16.msrb.mxu0 %v597_v17 }
  0x45   :  { %276 = vmatpush.bf16.msrb.mxu0 %v596_v20 }
  0x49   :  { %277 = vmatpush.bf16.msrb.mxu0 %v595_v23 }
  0x4c   :  { %278 = vmatmul.bf16.vlgmr.msrb.gmra.mxu0 %v590_v25  ;;  %188 = vmatmul.bf16.gmra.mxu3 %v593_v27 }
  0x4d   :  { %387 = vmatmul.bf16.gmra.mxu2 %v592_v26 }
  0x4e   :  { %293 = vmatmul.bf16.gmra.mxu1 %v593_v27 }
  0x5c   :  { %193 = vmatmul.bf16.gmra.mxu3 %v594_v28 }
  0x5d   :  { %392 = vmatmul.bf16.gmra.mxu2 %v593_v27 }
  0x5e   :  { %298 = vmatmul.bf16.gmra.mxu1 %v594_v28 }
  0x6d   :  { %397 = vmatmul.bf16.gmra.mxu2 %v594_v28 }
  0xa9   :  { %v781_v32 = vpop.f32.mrf.mxu0 }
  0xaa   :  { %v199_v41 = vrot.slane %v781_v32, 1 }
  0xab   :  { %v284_v31 = vpop.f32.mrf.mxu1 }
  0xaf   :  { %v179_v29 = vpop.f32.mrf.mxu3 }
  0xb0   :  { %v779_v30 = vpop.f32.mrf.mxu2  ;;  %v201_v47 = vrot.slane %v179_v29, 1 }
  0xb1   :  { %v176_v36 = vpop.f32.mrf.mxu0  ;;  %v403_v55 = vrot.slane %v779_v30, 2 }
  0xb2   :  { %v200_v44 = vrot.slane %v176_v36, 1 }
  0xb3   :  { %v286_v35 = vpop.f32.mrf.mxu1 }
  0xb4   :  { %v220_v48 = vsel %vm211_vm0, %v199_v41, %v200_v44  ;;  %v219_v56 = vsel %vm211_vm0, %v200_v44, %v201_v47 }
  0xb7   :  { %v181_v33 = vpop.f32.mrf.mxu3 }
  0xb8   :  { %v380_v34 = vpop.f32.mrf.mxu2  ;;  %v202_v49 = vrot.slane %v181_v33, 1 }
  0xb9   :  { %v404_v51 = vrot.slane %v380_v34, 2 }
  0xba   :  { %v218_v58 = vsel %vm211_vm0, %v201_v47, %v202_v49 }
  0xbb   :  { %v289_v40 = vpop.f32.mrf.mxu1  ;;  %v422_v62 = vsel %vm413_vm1, %v403_v55, %v404_v51  ;;  %v285_v5 = vadd.f32 %v284_v31, %v218_v58 }
  0xbf   :  { %v184_v37 = vpop.f32.mrf.mxu3 }
  0xc0   :  { %v383_v38 = vpop.f32.mrf.mxu2  ;;  %v203_v50 = vrot.slane %v184_v37, 1 }
  0xc1   :  { %v405_v52 = vrot.slane %v383_v38, 2 }
  0xc2   :  { %v217_v59 = vsel %vm211_vm0, %v202_v49, %v203_v50 }
  0xc3   :  { %v291_v60 = vpop.f32.mrf.mxu1  ;;  %v421_v63 = vsel %vm413_vm1, %v404_v51, %v405_v52  ;;  %v287_v6 = vadd.f32 %v286_v35, %v217_v59 }
  0xc7   :  { %v186_v45 = vpop.f32.mrf.mxu3 }
  0xc8   :  { %v385_v46 = vpop.f32.mrf.mxu2  ;;  %v204_v15 = vrot.slane %v186_v45, 1 }
  0xc9   :  { %v279_v42 = vpop.f32.mrf.mxu0  ;;  %v406_v54 = vrot.slane %v385_v46, 2 }
  0xca   :  { %v280_v53 = vadd.f32 %v279_v42, %v220_v48  ;;  %v216_v19 = vsel %vm211_vm0, %v203_v50, %v204_v15 }
  0xcb   :  { %v420_v2 = vsel %vm413_vm1, %v405_v52, %v406_v54  ;;  %v294_v14 = vpop.f32.mrf.mxu1  ;;  %v290_v24 = vadd.f32 %v289_v40, %v216_v19 }
  0xcc   :  { %v424_v1 = vadd.f32 %v422_v62, %v280_v53  ;;  %v426_v10 = vadd.f32 %v420_v2, %v285_v5 }
  0xcf   :  { %v189_v7 = vpop.f32.mrf.mxu3 }
  0xd0   :  { %v388_v0 = vpop.f32.mrf.mxu2  ;;  %v205_v16 = vrot.slane %v189_v7, 1 }
  0xd1   :  { %v281_v57 = vpop.f32.mrf.mxu0  ;;  %v407_v4 = vrot.slane %v388_v0, 2 }
  0xd2   :  { %v282_v61 = vadd.f32 %v281_v57, %v219_v56  ;;  %v215_v20 = vsel %vm211_vm0, %v204_v15, %v205_v16 }
  0xd3   :  { %v419_v9 = vsel %vm413_vm1, %v406_v54, %v407_v4  ;;  %v292_v25 = vadd.f32 %v291_v60, %v215_v20  ;;  %v296_v26 = vpop.f32.mrf.mxu1 }
  0xd4   :  { %v425_v3 = vadd.f32 %v421_v63, %v282_v61  ;;  %v427_v11 = vadd.f32 %v419_v9, %v287_v6 }
  0xd6   :  { %v622_v8 = vpack.c.bf16 %v425_v3, %v424_v1  ;;  %v627_v12 = vpack.c.bf16 %v427_v11, %v426_v10 }
  0xd7   :  { %v191_v17 = vpop.f32.mrf.mxu3 }
  0xd8   :  { %623 = vst [vmem:[#allocation7] sm:$0xff] %v622_v8   ;;  %v390_v13 = vpop.f32.mrf.mxu2  ;;  %v206_v35 = vrot.slane %v191_v17, 1 }
  0xd9   :  { %644 = vst [vmem:[#allocation7 + $0x8] sm:$0xff] %v627_v12   ;;  %v408_v18 = vrot.slane %v390_v13, 2 }
  0xda   :  { %v214_v39 = vsel %vm211_vm0, %v205_v16, %v206_v35 }
  0xdb   :  { %v418_v22 = vsel %vm413_vm1, %v407_v4, %v408_v18  ;;  %v299_v37 = vpop.f32.mrf.mxu1  ;;  %v295_v47 = vadd.f32 %v294_v14, %v214_v39 }
  0xdc   :  { %v428_v28 = vadd.f32 %v418_v22, %v290_v24 }
  0xdf   :  { %v194_v31 = vpop.f32.mrf.mxu3 }
  0xe0   :  { %v393_v21 = vpop.f32.mrf.mxu2  ;;  %v207_v36 = vrot.slane %v194_v31, 1 }
  0xe1   :  { %v409_v23 = vrot.slane %v393_v21, 2 }
  0xe2   :  { %v213_v40 = vsel %vm211_vm0, %v206_v35, %v207_v36 }
  0xe3   :  { %v417_v27 = vsel %vm413_vm1, %v408_v18, %v409_v23  ;;  %v297_v48 = vadd.f32 %v296_v26, %v213_v40  ;;  %v301_v57 = vpop.f32.mrf.mxu1 }
  0xe4   :  { %v429_v29 = vadd.f32 %v417_v27, %v292_v25 }
  0xe6   :  { %v632_v33 = vpack.c.bf16 %v429_v29, %v428_v28 }
  0xe7   :  { %v196_v42 = vpop.f32.mrf.mxu3 }
  0xe8   :  { %645 = vst [vmem:[#allocation7 + $0x10] sm:$0xff] %v632_v33   ;;  %v395_v34 = vpop.f32.mrf.mxu2  ;;  %v208_v49 = vrot.slane %v196_v42, 1 }
  0xe9   :  { %v410_v38 = vrot.slane %v395_v34, 2 }
  0xea   :  { %v212_v54 = vsel %vm211_vm0, %v207_v36, %v208_v49  ;;  %v221_v56 = vsel %vm211_vm0, %v208_v49, %v199_v41 }
  0xeb   :  { %v416_v45 = vsel %vm413_vm1, %v409_v23, %v410_v38  ;;  %v300_v60 = vadd.f32 %v299_v37, %v212_v54  ;;  %v302_v61 = vadd.f32 %v301_v57, %v221_v56 }
  0xec   :  { %v430_v51 = vadd.f32 %v416_v45, %v295_v47 }
  0xf0   :  { %v398_v44 = vpop.f32.mrf.mxu2 }
  0xf1   :  { %v411_v46 = vrot.slane %v398_v44, 2 }
  0xf3   :  { %v415_v50 = vsel %vm413_vm1, %v410_v38, %v411_v46 }
  0xf4   :  { %v431_v52 = vadd.f32 %v415_v50, %v297_v48 }
  0xf6   :  { %v637_v53 = vpack.c.bf16 %v431_v52, %v430_v51 }
  0xf8   :  { %646 = vst [vmem:[#allocation7 + $0x18] sm:$0xff] %v637_v53   ;;  %v400_v58 = vpop.f32.mrf.mxu2 }
  0xf9   :  { %v412_v59 = vrot.slane %v400_v58, 2 }
  0xfb   :  { %v414_v62 = vsel %vm413_vm1, %v411_v46, %v412_v59  ;;  %v423_v63 = vsel %vm413_vm1, %v412_v59, %v403_v55 }
  0xfc   :  { %v432_v32 = vadd.f32 %v414_v62, %v300_v60  ;;  %v433_v41 = vadd.f32 %v423_v63, %v302_v61 }
  0xfe   :  { %v642_v0 = vpack.c.bf16 %v433_v41, %v432_v32 }
 0x100   :  { %647 = vst [vmem:[#allocation7 + $0x20] sm:$0xff] %v642_v0  }
 0x101   :  { %466 = dma.vmem_to_hbm [thread:$0]  %s459_s1, 640, %s461_s23, [#allocation4], %s748_s17, %s748_s17, %s749_s18  }
 0x102   :  { %745 = dma.done.wait [#allocation4], 640  }
 0x103   :  { %746 = vsyncadd [#allocation4], 4294966656 }
 0x104   :  { %471 = vsyncpa [#allocation3], 1 }
 0x105   :  { %472 = vsyncpa [#allocation6], 1 }
 0x106   :  { %473 = vsyncpa [#allocation4], 1 }

</bundles_post_ra>
